<compile_context>
chip_gen: v7x
topology: tpu7x:2x2x1
jax: 0.10.0
libtpu: 0.0.40
codegen_flags: <defaults>
</compile_context>

<pallas_src>
import functools

import jax
import jax.numpy as jnp
from jax.experimental import pallas as pl
from jax.experimental.pallas import tpu as pltpu

LN_EPS = 1e-5          # torch_geometric.nn.LayerNorm eps
NEG_SLOPE = 0.2        # GATConv leaky_relu negative slope
NEG_INF = -1e30
ROW_TILE = 256         # dst-row tile
COL_TILE = 512         # src-col tile (online-softmax axis)


def _round_up(v, m):
    return (v + m - 1) // m * m


def _vmem_limit_bytes():
    """Generation-dependent scoped-VMEM request (leave headroom vs physical)."""
    try:
        cap = getattr(pltpu.get_tpu_info(), "vmem_capacity_bytes", None)
    except Exception:  # pragma: no cover - defensive on unusual backends
        cap = None
    if not cap:
        cap = 64 * 1024 * 1024          # conservative fallback (v7x physical)
    # 3/4 of physical: ~48 MiB on v7x, ~96 MiB on v5e/v6e.
    return int(min(max(cap * 3 // 4, 32 * 1024 * 1024), 112 * 1024 * 1024))


# --------------------------------------------------------------------------- #
# 1) prep: graph-mode LayerNorm + ELU + stacked GAT projection + att logits    #
# --------------------------------------------------------------------------- #
def _prep_kernel(num_heads, chp, cin_real,
                 x_ref, mt_ref, lnw_ref, lnb_ref, wg_ref, asrcw_ref, adstw_ref,
                 xp_ref, adst_ref, asrc_ref):
    x = x_ref[...]                                         # [Np, Cinp] f32
    mt = mt_ref[...]                                       # [Np, B] one-hot

    # PyG LayerNorm(mode='graph'): stats over all nodes & real features of a
    # graph, via feature row-sums + masked sublane reductions.  Uses
    # E[x^2]-mean^2 (clamped at 0): fine for normalized inputs, documented
    # cancellation risk for extreme magnitudes.
    rs = jnp.sum(x, axis=-1, keepdims=True)                # [Np, 1]
    rss = jnp.sum(x * x, axis=-1, keepdims=True)           # [Np, 1]
    counts = jnp.sum(mt, axis=0, keepdims=True)            # [1, B]
    norm = jnp.maximum(counts, 1.0) * cin_real
    mean_g = jnp.sum(mt * rs, axis=0, keepdims=True) / norm
    ex2_g = jnp.sum(mt * rss, axis=0, keepdims=True) / norm
    var_g = jnp.maximum(ex2_g - mean_g * mean_g, 0.0)
    mean_n = jnp.sum(mt * mean_g, axis=-1, keepdims=True)  # [Np, 1]
    var_n = jnp.sum(mt * var_g, axis=-1, keepdims=True)    # [Np, 1]

    h = (x - mean_n) * jax.lax.rsqrt(var_n + LN_EPS)
    h = h * lnw_ref[...] + lnb_ref[...]                    # affine
    # F.elu; exp(min(h,0)) avoids the transient inf on the positive branch.
    h = jnp.where(h > 0, h, jnp.exp(jnp.minimum(h, 0.0)) - 1.0)

    # One stacked bf16 matmul (fills the MXU), f32 accumulation.
    xp = jnp.dot(h.astype(jnp.bfloat16), wg_ref[...],
                 preferred_element_type=jnp.float32)       # [Np, H*Chp]
    xp_ref[...] = xp.astype(jnp.bfloat16)

    # attention logits per node & head: VPU multiply + lane reduce, one store.
    adst_cols, asrc_cols = [], []
    for hh in range(num_heads):
        sl = slice(hh * chp, (hh + 1) * chp)
        asrc_cols.append(jnp.sum(xp[:, sl] * asrcw_ref[:, sl],
                                 axis=-1, keepdims=True))
        adst_cols.append(jnp.sum(xp[:, sl] * adstw_ref[:, sl],
                                 axis=-1, keepdims=True))
    adst_ref[...] = jnp.concatenate(adst_cols, axis=-1)    # [Np, H]
    asrc_ref[...] = jnp.concatenate(asrc_cols, axis=-1)    # [Np, H]


# --------------------------------------------------------------------------- #
# 2) GATConv attention: 2-D grid, online softmax over source-column tiles      #
# --------------------------------------------------------------------------- #
def _attn_kernel(num_heads, chp,
                 a_ref, adst_ref, asrct_ref, xp_ref, gbias_ref, wrel_ref,
                 wroot_ref, gat_ref, snode_ref, m_sc, l_sc, acc_sc):
    i = pl.program_id(0)
    j = pl.program_id(1)
    row_tile, col_tile = a_ref.shape

    @pl.when(j == 0)
    def _():
        m_sc[...] = jnp.full_like(m_sc, NEG_INF)
        l_sc[...] = jnp.zeros_like(l_sc)
        acc_sc[...] = jnp.zeros_like(acc_sc)

    # adjacency block (int8 0/1) + in-kernel self-loop mask from iota
    af = a_ref[...].astype(jnp.float32)
    rows = jax.lax.broadcasted_iota(jnp.int32, (row_tile, col_tile), 0) + i * row_tile
    cols = jax.lax.broadcasted_iota(jnp.int32, (row_tile, col_tile), 1) + j * col_tile
    mask = jnp.logical_or(af > 0.0, rows == cols)
    maskf = mask.astype(jnp.float32)

    for h in range(num_heads):
        sl = slice(h * chp, (h + 1) * chp)
        e = adst_ref[:, h:h + 1] + asrct_ref[h:h + 1, :]   # [T, Ct]
        e = jnp.where(e > 0, e, NEG_SLOPE * e)             # leaky_relu
        e = jnp.where(mask, e, NEG_INF)
        m_old = m_sc[:, h:h + 1]
        m_new = jnp.maximum(m_old, jnp.max(e, axis=-1, keepdims=True))
        alpha = jnp.exp(m_old - m_new)
        # mask-multiply kills rows whose block is fully masked (m stays finite)
        p = jnp.exp(e - m_new) * maskf
        l_sc[:, h:h + 1] = alpha * l_sc[:, h:h + 1] + jnp.sum(p, axis=-1,
                                                              keepdims=True)
        acc_sc[:, sl] = alpha * acc_sc[:, sl] + jnp.dot(
            p.astype(jnp.bfloat16), xp_ref[:, sl],
            preferred_element_type=jnp.float32)
        m_sc[:, h:h + 1] = m_new
    # TODO(synk): attention dropout (p=0.3) is identity in eval mode.

    @pl.when(j == pl.num_programs(1) - 1)
    def _():
        srel = jnp.zeros((row_tile, 1), jnp.float32)
        sroot = jnp.zeros((row_tile, 1), jnp.float32)
        for h in range(num_heads):
            sl = slice(h * chp, (h + 1) * chp)
            g = acc_sc[:, sl] / l_sc[:, h:h + 1] + gbias_ref[:, sl]
            gat_ref[:, sl] = g
            # SAGPooling GraphConv scalars folded into the epilogue.
            srel = srel + jnp.sum(g * wrel_ref[:, sl], axis=-1, keepdims=True)
            sroot = sroot + jnp.sum(g * wroot_ref[:, sl], axis=-1, keepdims=True)
        snode_ref[...] = jnp.concatenate([srel, sroot], axis=-1)   # [T, 2]


# --------------------------------------------------------------------------- #
# 3) SAGPooling GraphConv score: mem-bound A read + VPU contraction            #
# --------------------------------------------------------------------------- #
def _score_kernel(a_ref, srel_ref, sroot_ref, brel_ref, score_ref):
    af = a_ref[...].astype(jnp.float32)                    # [T, Np] 0/1
    contrib = af * srel_ref[...]                           # broadcast [1, Np]
    score_ref[...] = (jnp.sum(contrib, axis=-1, keepdims=True)
                      + sroot_ref[...] + brel_ref[0, 0])


# --------------------------------------------------------------------------- #
# 4a) per-graph softmax stats (tiny, O(N*B))                                   #
# --------------------------------------------------------------------------- #
def _stats_kernel(score_ref, mt_ref, pgmax_ref, den_ref):
    score = score_ref[...]                                 # [Np, 1]
    mt = mt_ref[...]                                       # [Np, B]
    valid = jnp.sum(mt, axis=-1, keepdims=True)
    masked = jnp.where(mt > 0, score, NEG_INF)
    pgmax = jnp.max(masked, axis=0, keepdims=True)         # [1, B]
    smax_n = jnp.sum(mt * pgmax, axis=-1, keepdims=True)
    sc = jnp.where(valid > 0, score, NEG_INF)
    es = jnp.exp(sc - smax_n)
    den = jnp.maximum(jnp.sum(mt * es, axis=0, keepdims=True), 1e-30)
    pgmax_ref[...] = pgmax
    den_ref[...] = den


# --------------------------------------------------------------------------- #
# 4b) scale by softmax score + global_add_pool, row-tiled with emb accumulator #
# --------------------------------------------------------------------------- #
def _final_kernel(score_ref, mt_ref, m_ref, pgmax_ref, den_ref, gat_ref,
                  xout_ref, emb_ref):
    i = pl.program_id(0)
    score = score_ref[...]                                 # [T, 1]
    mt = mt_ref[...]                                       # [T, B]
    valid = jnp.sum(mt, axis=-1, keepdims=True)
    smax_n = jnp.sum(mt * pgmax_ref[...], axis=-1, keepdims=True)
    den_n = jnp.maximum(jnp.sum(mt * den_ref[...], axis=-1, keepdims=True), 1e-30)
    sc = jnp.where(valid > 0, score, NEG_INF)
    ss = jnp.exp(sc - smax_n) / den_n                      # SAGPooling softmax score
    # min_score=-1 keeps every node (softmax scores > 0 > -1) => no filtering.
    xo = gat_ref[...] * ss
    xout_ref[...] = xo
    # stacked add-pool matmul; 0/1 mask is exact in bf16, features lose ~3
    # digits before the f32 accumulation (intentional inference trade).
    part = jnp.dot(m_ref[...].astype(jnp.bfloat16), xo.astype(jnp.bfloat16),
                   preferred_element_type=jnp.float32)     # [B, H*Chp]

    @pl.when(i == 0)
    def _():
        emb_ref[...] = jnp.zeros_like(emb_ref)

    emb_ref[...] = emb_ref[...] + part


# --------------------------------------------------------------------------- #
# wrapper                                                                      #
# --------------------------------------------------------------------------- #
def mif_conv_block(x, edge_index, batch, params, *, num_graphs, num_heads):
    n, cin = x.shape
    wg = params["gat_lin_w"]                               # [Cin, H*Ch]
    ctot = wg.shape[1]
    ch = ctot // num_heads

    f32, bf16 = jnp.float32, jnp.bfloat16
    cinp = _round_up(cin, 128)
    chp = _round_up(ch, 128)
    ctotp = num_heads * chp

    if n <= COL_TILE:
        npad = _round_up(max(n, 8), 8)
        row_tile = col_tile = npad
    else:
        npad = _round_up(n, COL_TILE)                      # ROW_TILE | COL_TILE | npad
        row_tile, col_tile = ROW_TILE, COL_TILE
    n_row = npad // row_tile
    n_col = npad // col_tile

    vmem_limit = _vmem_limit_bytes()

    # ---- plain-JAX glue: densify graph structure & pad / flatten params ----
    xpad = jnp.zeros((npad, cinp), f32).at[:n, :cin].set(x.astype(f32))
    batch_pad = jnp.full((npad,), -1, jnp.int32).at[:n].set(batch.astype(jnp.int32))
    m = (batch_pad[None, :] == jnp.arange(num_graphs)[:, None]).astype(f32)  # [B, Np]
    mt = m.T                                                                 # [Np, B]
    src, dst = edge_index[0], edge_index[1]
    a = jnp.zeros((npad, npad), jnp.int8).at[dst, src].set(1)  # A[dst, src], int8 0/1

    def _flat_heads(v):                                     # [H, ch]-like -> [1, H*Chp]
        v = v.astype(f32).reshape(num_heads, ch)
        return jnp.pad(v, ((0, 0), (0, chp - ch))).reshape(1, ctotp)

    ln_w = jnp.zeros((1, cinp), f32).at[0, :cin].set(params["ln_w"].astype(f32))
    ln_b = jnp.zeros((1, cinp), f32).at[0, :cin].set(params["ln_b"].astype(f32))
    wg_flat = jnp.zeros((cinp, ctotp), f32).at[:cin, :].set(
        jnp.pad(wg.astype(f32).reshape(cin, num_heads, ch),
                ((0, 0), (0, 0), (0, chp - ch))).reshape(cin, ctotp)).astype(bf16)
    att_src = _flat_heads(params["gat_att_src"])
    att_dst = _flat_heads(params["gat_att_dst"])
    gbias = _flat_heads(params["gat_bias"])
    w_rel = _flat_heads(params["sag_w_rel"])
    w_root = _flat_heads(params["sag_w_root"])
    b_rel = params["sag_b_rel"].astype(f32).reshape(1, 1)

    vmem = pl.BlockSpec(memory_space=pltpu.MemorySpace.VMEM)
    smem = pl.BlockSpec(memory_space=pltpu.MemorySpace.SMEM)

    # ---- 1) prep (single block; O(N*C)) ----
    # TODO(synk): for very large N, row-tile this kernel with a two-pass LN-stats
    # reduction instead of a single VMEM-resident block.
    xp_bf, a_dst, a_src = pl.pallas_call(
        functools.partial(_prep_kernel, num_heads, chp, float(cin)),
        out_shape=(jax.ShapeDtypeStruct((npad, ctotp), bf16),
                   jax.ShapeDtypeStruct((npad, num_heads), f32),
                   jax.ShapeDtypeStruct((npad, num_heads), f32)),
        in_specs=[vmem] * 7,
        out_specs=(vmem, vmem, vmem),
        compiler_params=pltpu.CompilerParams(vmem_limit_bytes=vmem_limit),
    )(xpad, mt, ln_w, ln_b, wg_flat, att_src, att_dst)

    a_src_t = a_src.T                                       # [H, Np]; O(N*H) plumbing

    # ---- 2) GAT attention: dst-row tiles (parallel) x src-col tiles (arbitrary) ----
    gat, snode = pl.pallas_call(
        functools.partial(_attn_kernel, num_heads, chp),
        out_shape=(jax.ShapeDtypeStruct((npad, ctotp), f32),
                   jax.ShapeDtypeStruct((npad, 2), f32)),
        grid=(n_row, n_col),
        in_specs=[
            pl.BlockSpec((row_tile, col_tile), lambda i, j: (i, j)),    # A (int8)
            pl.BlockSpec((row_tile, num_heads), lambda i, j: (i, 0)),   # a_dst rows
            pl.BlockSpec((num_heads, col_tile), lambda i, j: (0, j)),   # a_src cols
            pl.BlockSpec((col_tile, ctotp), lambda i, j: (j, 0)),       # xp (streamed)
            pl.BlockSpec((1, ctotp), lambda i, j: (0, 0)),              # gat bias
            pl.BlockSpec((1, ctotp), lambda i, j: (0, 0)),              # w_rel
            pl.BlockSpec((1, ctotp), lambda i, j: (0, 0)),              # w_root
        ],
        out_specs=(pl.BlockSpec((row_tile, ctotp), lambda i, j: (i, 0)),
                   pl.BlockSpec((row_tile, 2), lambda i, j: (i, 0))),
        scratch_shapes=[pltpu.VMEM((row_tile, num_heads), f32),   # running max
                        pltpu.VMEM((row_tile, num_heads), f32),   # running denom
                        pltpu.VMEM((row_tile, ctotp), f32)],      # f32 accumulator
        compiler_params=pltpu.CompilerParams(
            dimension_semantics=("parallel", "arbitrary"),
            vmem_limit_bytes=vmem_limit),
    )(a, a_dst, a_src_t, xp_bf, gbias, w_rel, w_root)

    s_rel_row = snode[:, 0].reshape(1, npad)                # [1, Np]
    s_root_col = snode[:, 1:2]                              # [Np, 1]

    # ---- 3) SAGPooling GraphConv score (mem-bound A read, VPU only) ----
    score = pl.pallas_call(
        _score_kernel,
        out_shape=jax.ShapeDtypeStruct((npad, 1), f32),
        grid=(n_row,),
        in_specs=[
            pl.BlockSpec((row_tile, npad), lambda i: (i, 0)),           # A rows (int8)
            pl.BlockSpec((1, npad), lambda i: (0, 0)),                  # s_rel (resident)
            pl.BlockSpec((row_tile, 1), lambda i: (i, 0)),              # s_root rows
            smem,                                                       # b_rel scalar
        ],
        out_specs=pl.BlockSpec((row_tile, 1), lambda i: (i, 0)),
        compiler_params=pltpu.CompilerParams(
            dimension_semantics=("parallel",), vmem_limit_bytes=vmem_limit),
    )(a, s_rel_row, s_root_col, b_rel)

    # ---- 4a) per-graph softmax stats (tiny single block) ----
    pgmax, den = pl.pallas_call(
        _stats_kernel,
        out_shape=(jax.ShapeDtypeStruct((1, num_graphs), f32),
                   jax.ShapeDtypeStruct((1, num_graphs), f32)),
        in_specs=[vmem, vmem],
        out_specs=(vmem, vmem),
        compiler_params=pltpu.CompilerParams(vmem_limit_bytes=vmem_limit),
    )(score, mt)

    # ---- 4b) scale + global_add_pool, row-tiled (emb accumulated in-output) ----
    x_out_pad, emb_pad = pl.pallas_call(
        _final_kernel,
        out_shape=(jax.ShapeDtypeStruct((npad, ctotp), f32),
                   jax.ShapeDtypeStruct((num_graphs, ctotp), f32)),
        grid=(n_row,),
        in_specs=[
            pl.BlockSpec((row_tile, 1), lambda i: (i, 0)),              # score
            pl.BlockSpec((row_tile, num_graphs), lambda i: (i, 0)),     # mt rows
            pl.BlockSpec((num_graphs, row_tile), lambda i: (0, i)),     # m cols
            pl.BlockSpec((1, num_graphs), lambda i: (0, 0)),            # pgmax
            pl.BlockSpec((1, num_graphs), lambda i: (0, 0)),            # den
            pl.BlockSpec((row_tile, ctotp), lambda i: (i, 0)),          # gat rows
        ],
        out_specs=(pl.BlockSpec((row_tile, ctotp), lambda i: (i, 0)),
                   pl.BlockSpec((num_graphs, ctotp), lambda i: (0, 0))),
        compiler_params=pltpu.CompilerParams(
            dimension_semantics=("arbitrary",), vmem_limit_bytes=vmem_limit),
    )(score, mt, m, pgmax, den, gat)

    # strip padding & re-concatenate heads (layout plumbing only)
    x_out = x_out_pad[:n].reshape(n, num_heads, chp)[:, :, :ch].reshape(
        n, num_heads * ch)
    emb = emb_pad.reshape(num_graphs, num_heads, chp)[:, :, :ch].reshape(
        num_graphs, num_heads * ch)
    return x_out, emb


if __name__ == "__main__":
    key = jax.random.PRNGKey(0)
    N, B = 16, 2                      # 16 nodes, 2 graphs (8 nodes each)
    CIN, COUT, H = 32, 32, 4          # small stand-ins for 200/200/4
    CH = COUT // H

    ks = jax.random.split(key, 10)
    x = jax.random.normal(ks[0], (N, CIN), jnp.float32)
    batch = jnp.array([0] * 8 + [1] * 8, jnp.int32)

    # bidirectional ring within each 8-node graph (no self loops, no duplicates)
    src_list, dst_list = [], []
    for g in range(B):
        off = g * 8
        for k in range(8):
            u, v = off + k, off + (k + 1) % 8
            src_list += [u, v]
            dst_list += [v, u]
    edge_index = jnp.array([src_list, dst_list], jnp.int32)      # [2, 32]

    # deterministic synthetic parameters (shapes per module __init__)
    params = dict(
        ln_w=1.0 + 0.05 * jax.random.normal(ks[1], (CIN,), jnp.float32),
        ln_b=0.05 * jax.random.normal(ks[2], (CIN,), jnp.float32),
        gat_lin_w=0.2 * jax.random.normal(ks[3], (CIN, H * CH), jnp.float32),
        gat_att_src=0.2 * jax.random.normal(ks[4], (H, CH), jnp.float32),
        gat_att_dst=0.2 * jax.random.normal(ks[5], (H, CH), jnp.float32),
        gat_bias=0.05 * jax.random.normal(ks[6], (H * CH,), jnp.float32),
        sag_w_rel=0.2 * jax.random.normal(ks[7], (H * CH,), jnp.float32),
        sag_b_rel=0.05 * jax.random.normal(ks[8], (1,), jnp.float32),
        sag_w_root=0.2 * jax.random.normal(ks[9], (H * CH,), jnp.float32),
    )

    x_nodes, graph_emb = mif_conv_block(x, edge_index, batch, params,
                                        num_graphs=B, num_heads=H)
    jax.block_until_ready((x_nodes, graph_emb))
    assert x_nodes.shape == (N, COUT) and graph_emb.shape == (B, COUT)
    assert bool(jnp.all(jnp.isfinite(x_nodes))) and bool(jnp.all(jnp.isfinite(graph_emb)))
    print("KERNEL_OK")
</pallas_src>

<mosaic_0001>
module attributes {stable_mosaic.version = 11 : i64} {
  func.func @_prep_kernel(%arg0: memref<16x128xf32, #tpu.memory_space<vmem>>, %arg1: memref<16x2xf32, #tpu.memory_space<vmem>>, %arg2: memref<1x128xf32, #tpu.memory_space<vmem>>, %arg3: memref<1x128xf32, #tpu.memory_space<vmem>>, %arg4: memref<128x512xbf16, #tpu.memory_space<vmem>>, %arg5: memref<1x512xf32, #tpu.memory_space<vmem>>, %arg6: memref<1x512xf32, #tpu.memory_space<vmem>>, %arg7: memref<16x512xbf16, #tpu.memory_space<vmem>>, %arg8: memref<16x4xf32, #tpu.memory_space<vmem>>, %arg9: memref<16x4xf32, #tpu.memory_space<vmem>>) attributes {dimension_semantics = [], scalar_prefetch = 0 : i64, scratch_operands = 0 : i64, tpu.core_type = #tpu.core_type<tc>} {
    %c0 = arith.constant 0 : index
    %c0_0 = arith.constant 0 : index
    %0 = vector.load %arg0[%c0, %c0_0] : memref<16x128xf32, #tpu.memory_space<vmem>>, vector<16x128xf32>
    %c0_1 = arith.constant 0 : index
    %c0_2 = arith.constant 0 : index
    %1 = vector.load %arg1[%c0_1, %c0_2] : memref<16x2xf32, #tpu.memory_space<vmem>>, vector<16x2xf32>
    %cst = arith.constant dense<0.000000e+00> : vector<16xf32>
    %2 = vector.multi_reduction <add>, %0, %cst [1] : vector<16x128xf32> to vector<16xf32>
    %3 = vector.shape_cast %2 : vector<16xf32> to vector<16x1xf32>
    %4 = arith.mulf %0, %0 : vector<16x128xf32>
    %cst_3 = arith.constant dense<0.000000e+00> : vector<16xf32>
    %5 = vector.multi_reduction <add>, %4, %cst_3 [1] : vector<16x128xf32> to vector<16xf32>
    %6 = vector.shape_cast %5 : vector<16xf32> to vector<16x1xf32>
    %cst_4 = arith.constant dense<0.000000e+00> : vector<2xf32>
    %7 = vector.multi_reduction <add>, %1, %cst_4 [0] : vector<16x2xf32> to vector<2xf32>
    %8 = vector.shape_cast %7 : vector<2xf32> to vector<1x2xf32>
    %cst_5 = arith.constant 1.000000e+00 : f32
    %9 = vector.broadcast %cst_5 : f32 to vector<1x2xf32>
    %10 = arith.maximumf %8, %9 : vector<1x2xf32>
    %cst_6 = arith.constant 3.200000e+01 : f32
    %11 = vector.broadcast %cst_6 : f32 to vector<1x2xf32>
    %12 = arith.mulf %10, %11 : vector<1x2xf32>
    %13 = vector.broadcast %3 : vector<16x1xf32> to vector<16x2xf32>
    %14 = arith.mulf %1, %13 : vector<16x2xf32>
    %cst_7 = arith.constant dense<0.000000e+00> : vector<2xf32>
    %15 = vector.multi_reduction <add>, %14, %cst_7 [0] : vector<16x2xf32> to vector<2xf32>
    %16 = vector.shape_cast %15 : vector<2xf32> to vector<1x2xf32>
    %17 = arith.divf %16, %12 : vector<1x2xf32>
    %18 = vector.broadcast %6 : vector<16x1xf32> to vector<16x2xf32>
    %19 = arith.mulf %1, %18 : vector<16x2xf32>
    %cst_8 = arith.constant dense<0.000000e+00> : vector<2xf32>
    %20 = vector.multi_reduction <add>, %19, %cst_8 [0] : vector<16x2xf32> to vector<2xf32>
    %21 = vector.shape_cast %20 : vector<2xf32> to vector<1x2xf32>
    %22 = arith.divf %21, %12 : vector<1x2xf32>
    %23 = arith.mulf %17, %17 : vector<1x2xf32>
    %24 = arith.subf %22, %23 : vector<1x2xf32>
    %cst_9 = arith.constant 0.000000e+00 : f32
    %25 = vector.broadcast %cst_9 : f32 to vector<1x2xf32>
    %26 = arith.maximumf %24, %25 : vector<1x2xf32>
    %27 = vector.broadcast %17 : vector<1x2xf32> to vector<16x2xf32>
    %28 = arith.mulf %1, %27 : vector<16x2xf32>
    %cst_10 = arith.constant dense<0.000000e+00> : vector<16xf32>
    %29 = vector.multi_reduction <add>, %28, %cst_10 [1] : vector<16x2xf32> to vector<16xf32>
    %30 = vector.shape_cast %29 : vector<16xf32> to vector<16x1xf32>
    %31 = vector.broadcast %26 : vector<1x2xf32> to vector<16x2xf32>
    %32 = arith.mulf %1, %31 : vector<16x2xf32>
    %cst_11 = arith.constant dense<0.000000e+00> : vector<16xf32>
    %33 = vector.multi_reduction <add>, %32, %cst_11 [1] : vector<16x2xf32> to vector<16xf32>
    %34 = vector.shape_cast %33 : vector<16xf32> to vector<16x1xf32>
    %35 = vector.broadcast %30 : vector<16x1xf32> to vector<16x128xf32>
    %36 = arith.subf %0, %35 : vector<16x128xf32>
    %cst_12 = arith.constant 9.99999974E-6 : f32
    %37 = vector.broadcast %cst_12 : f32 to vector<16x1xf32>
    %38 = arith.addf %34, %37 : vector<16x1xf32>
    %39 = math.rsqrt %38 : vector<16x1xf32>
    %40 = vector.broadcast %39 : vector<16x1xf32> to vector<16x128xf32>
    %41 = arith.mulf %36, %40 : vector<16x128xf32>
    %c0_13 = arith.constant 0 : index
    %c0_14 = arith.constant 0 : index
    %42 = vector.load %arg2[%c0_13, %c0_14] : memref<1x128xf32, #tpu.memory_space<vmem>>, vector<1x128xf32>
    %43 = vector.broadcast %42 : vector<1x128xf32> to vector<16x128xf32>
    %44 = arith.mulf %41, %43 : vector<16x128xf32>
    %c0_15 = arith.constant 0 : index
    %c0_16 = arith.constant 0 : index
    %45 = vector.load %arg3[%c0_15, %c0_16] : memref<1x128xf32, #tpu.memory_space<vmem>>, vector<1x128xf32>
    %46 = vector.broadcast %45 : vector<1x128xf32> to vector<16x128xf32>
    %47 = arith.addf %44, %46 : vector<16x128xf32>
    %cst_17 = arith.constant 0.000000e+00 : f32
    %48 = vector.broadcast %cst_17 : f32 to vector<16x128xf32>
    %49 = arith.cmpf ogt, %47, %48 : vector<16x128xf32>
    %cst_18 = arith.constant 0.000000e+00 : f32
    %50 = vector.broadcast %cst_18 : f32 to vector<16x128xf32>
    %51 = arith.minimumf %47, %50 : vector<16x128xf32>
    %52 = math.exp %51 : vector<16x128xf32>
    %cst_19 = arith.constant 1.000000e+00 : f32
    %53 = vector.broadcast %cst_19 : f32 to vector<16x128xf32>
    %54 = arith.subf %52, %53 : vector<16x128xf32>
    %55 = arith.select %49, %47, %54 : vector<16x128xi1>, vector<16x128xf32>
    %56 = arith.truncf %55 : vector<16x128xf32> to vector<16x128xbf16>
    %c0_20 = arith.constant 0 : index
    %c0_21 = arith.constant 0 : index
    %57 = vector.load %arg4[%c0_20, %c0_21] : memref<128x512xbf16, #tpu.memory_space<vmem>>, vector<128x512xbf16>
    %cst_22 = arith.constant dense<0.000000e+00> : vector<16x512xf32>
    %58 = tpu.matmul %56, %57, %cst_22 {dimension_numbers = #tpu.dot_dimension_numbers<[1], [0], [0], [1], [0, 0, 1, 1], [], []>} : vector<16x128xbf16>, vector<128x512xbf16>, vector<16x512xf32> -> vector<16x512xf32>
    %59 = arith.truncf %58 : vector<16x512xf32> to vector<16x512xbf16>
    %c0_23 = arith.constant 0 : index
    %c0_24 = arith.constant 0 : index
    %60 = vector.load %arg7[%c0_23, %c0_24] : memref<16x512xbf16, #tpu.memory_space<vmem>>, vector<16x512xbf16>
    tpu.vector_store %arg7[%c0_23, %c0_24], %59 {strides = array<i32>} : memref<16x512xbf16, #tpu.memory_space<vmem>>, vector<16x512xbf16>,
    %61 = vector.extract_strided_slice %58 {offsets = [0, 0], sizes = [16, 128], strides = [1, 1]} : vector<16x512xf32> to vector<16x128xf32>
    %c0_25 = arith.constant 0 : index
    %c0_26 = arith.constant 0 : index
    %62 = vector.load %arg5[%c0_25, %c0_26] : memref<1x512xf32, #tpu.memory_space<vmem>>, vector<1x128xf32>
    %63 = vector.broadcast %62 : vector<1x128xf32> to vector<16x128xf32>
    %64 = arith.mulf %61, %63 : vector<16x128xf32>
    %cst_27 = arith.constant dense<0.000000e+00> : vector<16xf32>
    %65 = vector.multi_reduction <add>, %64, %cst_27 [1] : vector<16x128xf32> to vector<16xf32>
    %66 = vector.shape_cast %65 : vector<16xf32> to vector<16x1xf32>
    %67 = vector.extract_strided_slice %58 {offsets = [0, 0], sizes = [16, 128], strides = [1, 1]} : vector<16x512xf32> to vector<16x128xf32>
    %c0_28 = arith.constant 0 : index
    %c0_29 = arith.constant 0 : index
    %68 = vector.load %arg6[%c0_28, %c0_29] : memref<1x512xf32, #tpu.memory_space<vmem>>, vector<1x128xf32>
    %69 = vector.broadcast %68 : vector<1x128xf32> to vector<16x128xf32>
    %70 = arith.mulf %67, %69 : vector<16x128xf32>
    %cst_30 = arith.constant dense<0.000000e+00> : vector<16xf32>
    %71 = vector.multi_reduction <add>, %70, %cst_30 [1] : vector<16x128xf32> to vector<16xf32>
    %72 = vector.shape_cast %71 : vector<16xf32> to vector<16x1xf32>
    %73 = vector.extract_strided_slice %58 {offsets = [0, 128], sizes = [16, 128], strides = [1, 1]} : vector<16x512xf32> to vector<16x128xf32>
    %c0_31 = arith.constant 0 : index
    %c128 = arith.constant 128 : index
    %74 = vector.load %arg5[%c0_31, %c128] : memref<1x512xf32, #tpu.memory_space<vmem>>, vector<1x128xf32>
    %75 = vector.broadcast %74 : vector<1x128xf32> to vector<16x128xf32>
    %76 = arith.mulf %73, %75 : vector<16x128xf32>
    %cst_32 = arith.constant dense<0.000000e+00> : vector<16xf32>
    %77 = vector.multi_reduction <add>, %76, %cst_32 [1] : vector<16x128xf32> to vector<16xf32>
    %78 = vector.shape_cast %77 : vector<16xf32> to vector<16x1xf32>
    %79 = vector.extract_strided_slice %58 {offsets = [0, 128], sizes = [16, 128], strides = [1, 1]} : vector<16x512xf32> to vector<16x128xf32>
    %c0_33 = arith.constant 0 : index
    %c128_34 = arith.constant 128 : index
    %80 = vector.load %arg6[%c0_33, %c128_34] : memref<1x512xf32, #tpu.memory_space<vmem>>, vector<1x128xf32>
    %81 = vector.broadcast %80 : vector<1x128xf32> to vector<16x128xf32>
    %82 = arith.mulf %79, %81 : vector<16x128xf32>
    %cst_35 = arith.constant dense<0.000000e+00> : vector<16xf32>
    %83 = vector.multi_reduction <add>, %82, %cst_35 [1] : vector<16x128xf32> to vector<16xf32>
    %84 = vector.shape_cast %83 : vector<16xf32> to vector<16x1xf32>
    %85 = vector.extract_strided_slice %58 {offsets = [0, 256], sizes = [16, 128], strides = [1, 1]} : vector<16x512xf32> to vector<16x128xf32>
    %c0_36 = arith.constant 0 : index
    %c256 = arith.constant 256 : index
    %86 = vector.load %arg5[%c0_36, %c256] : memref<1x512xf32, #tpu.memory_space<vmem>>, vector<1x128xf32>
    %87 = vector.broadcast %86 : vector<1x128xf32> to vector<16x128xf32>
    %88 = arith.mulf %85, %87 : vector<16x128xf32>
    %cst_37 = arith.constant dense<0.000000e+00> : vector<16xf32>
    %89 = vector.multi_reduction <add>, %88, %cst_37 [1] : vector<16x128xf32> to vector<16xf32>
    %90 = vector.shape_cast %89 : vector<16xf32> to vector<16x1xf32>
    %91 = vector.extract_strided_slice %58 {offsets = [0, 256], sizes = [16, 128], strides = [1, 1]} : vector<16x512xf32> to vector<16x128xf32>
    %c0_38 = arith.constant 0 : index
    %c256_39 = arith.constant 256 : index
    %92 = vector.load %arg6[%c0_38, %c256_39] : memref<1x512xf32, #tpu.memory_space<vmem>>, vector<1x128xf32>
    %93 = vector.broadcast %92 : vector<1x128xf32> to vector<16x128xf32>
    %94 = arith.mulf %91, %93 : vector<16x128xf32>
    %cst_40 = arith.constant dense<0.000000e+00> : vector<16xf32>
    %95 = vector.multi_reduction <add>, %94, %cst_40 [1] : vector<16x128xf32> to vector<16xf32>
    %96 = vector.shape_cast %95 : vector<16xf32> to vector<16x1xf32>
    %97 = vector.extract_strided_slice %58 {offsets = [0, 384], sizes = [16, 128], strides = [1, 1]} : vector<16x512xf32> to vector<16x128xf32>
    %c0_41 = arith.constant 0 : index
    %c384 = arith.constant 384 : index
    %98 = vector.load %arg5[%c0_41, %c384] : memref<1x512xf32, #tpu.memory_space<vmem>>, vector<1x128xf32>
    %99 = vector.broadcast %98 : vector<1x128xf32> to vector<16x128xf32>
    %100 = arith.mulf %97, %99 : vector<16x128xf32>
    %cst_42 = arith.constant dense<0.000000e+00> : vector<16xf32>
    %101 = vector.multi_reduction <add>, %100, %cst_42 [1] : vector<16x128xf32> to vector<16xf32>
    %102 = vector.shape_cast %101 : vector<16xf32> to vector<16x1xf32>
    %103 = vector.extract_strided_slice %58 {offsets = [0, 384], sizes = [16, 128], strides = [1, 1]} : vector<16x512xf32> to vector<16x128xf32>
    %c0_43 = arith.constant 0 : index
    %c384_44 = arith.constant 384 : index
    %104 = vector.load %arg6[%c0_43, %c384_44] : memref<1x512xf32, #tpu.memory_space<vmem>>, vector<1x128xf32>
    %105 = vector.broadcast %104 : vector<1x128xf32> to vector<16x128xf32>
    %106 = arith.mulf %103, %105 : vector<16x128xf32>
    %cst_45 = arith.constant dense<0.000000e+00> : vector<16xf32>
    %107 = vector.multi_reduction <add>, %106, %cst_45 [1] : vector<16x128xf32> to vector<16xf32>
    %108 = vector.shape_cast %107 : vector<16xf32> to vector<16x1xf32>
    %109 = tpu.concatenate %72, %84, %96, %108 in 1 : vector<16x1xf32>, vector<16x1xf32>, vector<16x1xf32>, vector<16x1xf32> -> vector<16x4xf32>
    %c0_46 = arith.constant 0 : index
    %c0_47 = arith.constant 0 : index
    %110 = vector.load %arg8[%c0_46, %c0_47] : memref<16x4xf32, #tpu.memory_space<vmem>>, vector<16x4xf32>
    tpu.vector_store %arg8[%c0_46, %c0_47], %109 {strides = array<i32>} : memref<16x4xf32, #tpu.memory_space<vmem>>, vector<16x4xf32>,
    %111 = tpu.concatenate %66, %78, %90, %102 in 1 : vector<16x1xf32>, vector<16x1xf32>, vector<16x1xf32>, vector<16x1xf32> -> vector<16x4xf32>
    %c0_48 = arith.constant 0 : index
    %c0_49 = arith.constant 0 : index
    %112 = vector.load %arg9[%c0_48, %c0_49] : memref<16x4xf32, #tpu.memory_space<vmem>>, vector<16x4xf32>
    tpu.vector_store %arg9[%c0_48, %c0_49], %111 {strides = array<i32>} : memref<16x4xf32, #tpu.memory_space<vmem>>, vector<16x4xf32>,
    return
  }
}

</mosaic_0001>

<bundles_post_ra>
// kernel: tpu_custom_call.1
= control target key start
LH: loop header
LB: loop body
LE: loop exit
PB: predicated region body
PF: predicated region fallthrough
CT: control target
= control target key end

     0   :  { %15 = vsyncpa [#allocation3], 0  ;;  %s944_s0 = inlined_call_operand.vmem [shape: f32[16,128], index: 0, kind: input, shape index: {}]   ;;  %s945_s1 = inlined_call_operand.vmem [shape: f32[16,2], index: 1, kind: input, shape index: {}]   ;;  %s946_s2 = inlined_call_operand.vmem [shape: f32[1,128], index: 2, kind: input, shape index: {}]   ;;  %s947_s3 = inlined_call_operand.vmem [shape: f32[1,128], index: 3, kind: input, shape index: {}]   ;;  %s948_s4 = inlined_call_operand.hbm [shape: bf16[128,512], index: 4, kind: input, shape index: {}]   ;;  %s949_s5 = inlined_call_operand.vmem [shape: f32[1,512], index: 5, kind: input, shape index: {}]   ;;  %s950_s6 = inlined_call_operand.vmem [shape: f32[1,512], index: 6, kind: input, shape index: {}]   ;;  %s951_s7 = inlined_call_operand.hbm [shape: bf16[16,512], index: 7, kind: output, shape index: {0}]   ;;  %s952_s8 = inlined_call_operand.vmem [shape: f32[16,4], index: 8, kind: output, shape index: {1}]   ;;  %s953_s9 = inlined_call_operand.vmem [shape: f32[16,4], index: 9, kind: output, shape index: {2}]  }
   0x1   :  { %16 = vsyncpa [#allocation4], 0  ;;  %s771_s30 = smov [#allocation2]   ;;  %s723_s13 = scalar_lea.hbm %s948_s4, 4096 }
   0x2   :  { %s30_s10 = sshll.u32 %s771_s30, 4  ;;  %p724_p0 = scmp.ne.s32.totalorder %s948_s4, %s723_s13  ;;  %s31_s10 = int_to_ptr.vmem [resolvable:$true] %s30_s10 }
   0x3   :  { %p727_p1 = scmp.lt.u32.totalorder %s723_s13, %s948_s4 }
   0x5   :  { %p729_p2 = pnand %p727_p1, %p724_p0 }
   0x7   :  { %732 = shalt.err (!%p729_p2)
}
   0x8   :  { %s733_s18 = scalar_lea.vmem %s31_s10, 4096  ;;  %p738_p4 = scmp.lt.s32.totalorder %s31_s10, %s31_s10 }
   0x9   :  { %p734_p3 = scmp.ne.s32.totalorder %s31_s10, %s733_s18  ;;  %p739_p5 = scmp.lt.s32.totalorder %s733_s18, %s733_s18 }
   0xb   :  { %p740_p6 = por %p739_p5, %p738_p4 }
   0xd   :  { %p741_p7 = pnand %p740_p6, %p734_p3 }
   0xf   :  { %744 = shalt.err (!%p741_p7)
}
  0x10   :  { %s772_s19 = smov 256   ;;  %s773_s20 = smov 16  }
  0x11   :  { %36 = dma.hbm_to_vmem [thread:$0]  %s948_s4, 4096, %s31_s10, [#allocation3], %s772_s19, %s772_s19, %s773_s20  }
  0x12   :  { %767 = dma.done.wait [#allocation3], 4096  }
  0x13   :  { %768 = vsyncadd [#allocation3], 4294963200  ;;  %v844_v0 = vld [vmem:[%s944_s0] sm:$0xff]  ;;  %v849_v1 = vld [vmem:[%s944_s0 + $0x8] sm:$0xff]  ;;  %vm59_vm0 = vcmask 15360   ;;  %s775_s4 = smov [#allocation5]  }
  0x14   :  { %49 = vadd.xlane.f32.xlu0 %v844_v0  ;;  %v53_v2 = vmul.f32 %v844_v0, %v844_v0  ;;  %v54_v3 = vmul.f32 %v849_v1, %v849_v1  ;;  %v47_v4 = vld [vmem:[%s945_s1] sm:$0xff]  ;;  %v48_v5 = vld [vmem:[%s945_s1 + $0x8] sm:$0xff]  ;;  %s588_s27 = sshll.u32 %s775_s4, 4  ;;  %s589_s27 = int_to_ptr.vmem [resolvable:$true] %s588_s27 }
  0x15   :  { %v60_v6 = vsel %vm59_vm0, %v47_v4, 0.0  ;;  %v61_v7 = vsel %vm59_vm0, %v48_v5, 0.0  ;;  %v665_v57 = vld [vmem:[#allocation2 + $0x4] ss:$16 sps:$4 sm:$0xff]   ;;  %v667_v58 = vld [vmem:[#allocation2 + $0xc] ss:$16 sps:$4 sm:$0xff]   ;;  %p750_p9 = scmp.lt.s32.totalorder %s589_s27, %s589_s27 }
  0x16   :  { %55 = vadd.xlane.f32.xlu1 %v53_v2  ;;  %v62_v8 = vadd.f32 %v61_v7, %v60_v6  ;;  %v669_v59 = vld [vmem:[#allocation2] ss:$16 sps:$4 sm:$0xff]   ;;  %v670_v60 = vld [vmem:[#allocation2 + $0x8] ss:$16 sps:$4 sm:$0xff]   ;;  %346 = vmatprep.subr.bf16.mxu0 %v665_v57  ;;  %v671_v61 = vld [vmem:[#allocation2 + $0x24] ss:$16 sps:$4 sm:$0xff]  }
  0x17   :  { %389 = vmatprep.subr.bf16.mxu1 %v667_v58  ;;  %347 = vmatpush1.bf16.msra.mxu0 %v669_v59  ;;  %v673_v62 = vld [vmem:[#allocation2 + $0x2c] ss:$16 sps:$4 sm:$0xff]   ;;  %v675_v63 = vld [vmem:[#allocation2 + $0x20] ss:$16 sps:$4 sm:$0xff]   ;;  %v676_v2 = vld [vmem:[#allocation2 + $0x28] ss:$16 sps:$4 sm:$0xff]  }
  0x18   :  { %51 = vadd.xlane.f32.xlu0 %v849_v1  ;;  %v63_v9 = vrot.slane %v62_v8, 4  ;;  %390 = vmatpush1.bf16.msra.mxu1 %v670_v60  ;;  %v682_v6 = vld [vmem:[#allocation2 + $0x48] ss:$16 sps:$4 sm:$0xff]   ;;  %v683_v7 = vld [vmem:[#allocation2 + $0x64] ss:$16 sps:$4 sm:$0xff]   ;;  %s745_s28 = scalar_lea.vmem %s589_s27, 512 }
  0x19   :  { %348 = vmatprep.subr.bf16.mxu0 %v671_v61  ;;  %391 = vmatprep.subr.bf16.mxu1 %v673_v62  ;;  %p746_p8 = scmp.ne.s32.totalorder %s589_s27, %s745_s28  ;;  %p751_p10 = scmp.lt.s32.totalorder %s745_s28, %s745_s28 }
  0x1a   :  { %57 = vadd.xlane.f32.xlu1 %v54_v3  ;;  %v64_v10 = vadd.f32 %v63_v9, %v62_v8  ;;  %v677_v3 = vld [vmem:[#allocation2 + $0x44] ss:$16 sps:$4 sm:$0xff]   ;;  %v685_v8 = vld [vmem:[#allocation2 + $0x6c] ss:$16 sps:$4 sm:$0xff]   ;;  %v687_v9 = vld [vmem:[#allocation2 + $0x60] ss:$16 sps:$4 sm:$0xff]  }
  0x1b   :  { %349 = vmatpush1.bf16.msra.mxu0 %v675_v63  ;;  %p752_p11 = por %p751_p10, %p750_p9 }
  0x1c   :  { %v65_v11 = vrot.slane %v64_v10, 2  ;;  %392 = vmatpush1.bf16.msra.mxu1 %v676_v2  ;;  %350 = vmatprep.subr.bf16.mxu0 %v677_v3  ;;  %v649_v3 = vld [vmem:[%s950_s6] ss:$0 sm:$0xff] }
  0x1d   :  { %p753_p12 = pnand %p752_p11, %p746_p8 }
  0x1e   :  { %v66_v12 = vadd.f32 %v65_v11, %v64_v10  ;;  %v688_v10 = vld [vmem:[#allocation2 + $0x68] ss:$16 sps:$4 sm:$0xff]   ;;  %v689_v11 = vld [vmem:[#allocation2 + $0x84] ss:$16 sps:$4 sm:$0xff]  }
  0x20   :  { %v67_v13 = vrot.slane %v66_v12, 1 }
  0x22   :  { %v68_v14 = vadd.f32 %v67_v13, %v66_v12  ;;  %v691_v12 = vld [vmem:[#allocation2 + $0x8c] ss:$16 sps:$4 sm:$0xff]   ;;  %v693_v13 = vld [vmem:[#allocation2 + $0x80] ss:$16 sps:$4 sm:$0xff]  }
  0x24   :  { %v69_v16 = vmax.f32 %v68_v14, 1.0  ;;  %v694_v14 = vld [vmem:[#allocation2 + $0x88] ss:$16 sps:$4 sm:$0xff]  }
  0x26   :  { %v70_v22 = vmul.f32 32.0, %v69_v16  ;;  %v697_v16 = vld [vmem:[#allocation2 + $0xac] ss:$16 sps:$4 sm:$0xff]  }
  0x28   :  { %713 = vrcp.f32 %v70_v22  ;;  %v706_v22 = vld [vmem:[#allocation2 + $0xc8] ss:$16 sps:$4 sm:$0xff]  }
  0x32   :  { %v714_v40 = vpop.eup %713 }
  0xa1   :  { %v50_v15 = vpop.xlane.xlu0 %49 }
  0xa2   :  { %v71_v18 = vmul.f32 %v50_v15, %v47_v4  ;;  %v695_v15 = vld [vmem:[#allocation2 + $0xa4] ss:$16 sps:$4 sm:$0xff]  }
  0xa3   :  { %v56_v17 = vpop.xlane.xlu1 %55 }
  0xa4   :  { %v84_v20 = vmul.f32 %v56_v17, %v47_v4  ;;  %v73_v24 = vsel %vm59_vm0, %v71_v18, 0.0  ;;  %v699_v17 = vld [vmem:[#allocation2 + $0xa0] ss:$16 sps:$4 sm:$0xff]   ;;  %v700_v18 = vld [vmem:[#allocation2 + $0xa8] ss:$16 sps:$4 sm:$0xff]  }
  0xa5   :  { %v52_v19 = vpop.xlane.xlu0 %51 }
  0xa6   :  { %v72_v21 = vmul.f32 %v52_v19, %v48_v5  ;;  %v86_v28 = vsel %vm59_vm0, %v84_v20, 0.0  ;;  %v701_v19 = vld [vmem:[#allocation2 + $0xc4] ss:$16 sps:$4 sm:$0xff]   ;;  %v703_v20 = vld [vmem:[#allocation2 + $0xcc] ss:$16 sps:$4 sm:$0xff]  }
  0xa7   :  { %v58_v23 = vpop.xlane.xlu1 %57 }
  0xa8   :  { %v74_v25 = vsel %vm59_vm0, %v72_v21, 0.0  ;;  %v85_v26 = vmul.f32 %v58_v23, %v48_v5  ;;  %v705_v21 = vld [vmem:[#allocation2 + $0xc0] ss:$16 sps:$4 sm:$0xff]   ;;  %v707_v23 = vld [vmem:[#allocation2 + $0xe4] ss:$16 sps:$4 sm:$0xff]  }
  0xa9   :  { %v75_v27 = vadd.f32 %v74_v25, %v73_v24  ;;  %v709_v24 = vld [vmem:[#allocation2 + $0xec] ss:$16 sps:$4 sm:$0xff]   ;;  %v774_v25 = vmov 0  }
  0xaa   :  { %v87_v29 = vsel %vm59_vm0, %v85_v26, 0.0  ;;  %378 = vmatprep.mubr.bf16.mxu0 %v774_v25  ;;  %421 = vmatprep.mubr.bf16.mxu1 %v774_v25  ;;  %v711_v26 = vld [vmem:[#allocation2 + $0xe0] ss:$16 sps:$4 sm:$0xff]  }
  0xab   :  { %v76_v30 = vrot.slane %v75_v27, 4  ;;  %v88_v31 = vadd.f32 %v87_v29, %v86_v28  ;;  %v655_v25 = vld [vmem:[%s950_s6 + $0x3] ss:$0 sm:$0xff] }
  0xad   :  { %v77_v32 = vadd.f32 %v76_v30, %v75_v27  ;;  %v89_v33 = vrot.slane %v88_v31, 4  ;;  %v712_v27 = vld [vmem:[#allocation2 + $0xe8] ss:$16 sps:$4 sm:$0xff]  }
  0xaf   :  { %v78_v34 = vrot.slane %v77_v32, 2  ;;  %v90_v35 = vadd.f32 %v89_v33, %v88_v31 }
  0xb1   :  { %v79_v36 = vadd.f32 %v78_v34, %v77_v32  ;;  %v91_v37 = vrot.slane %v90_v35, 2 }
  0xb3   :  { %v80_v38 = vrot.slane %v79_v36, 1  ;;  %v92_v39 = vadd.f32 %v91_v37, %v90_v35 }
  0xb5   :  { %v81_v41 = vadd.f32 %v80_v38, %v79_v36  ;;  %v93_v42 = vrot.slane %v92_v39, 1  ;;  %v608_v36 = vld [vmem:[%s946_s2] ss:$0 sm:$0xff] }
  0xb7   :  { %v83_v43 = vmul.f32 %v714_v40, %v81_v41  ;;  %v94_v44 = vadd.f32 %v93_v42, %v92_v39 }
  0xb9   :  { %v95_v45 = vmul.f32 %v714_v40, %v94_v44  ;;  %v96_v46 = vmul.f32 %v83_v43, %v83_v43  ;;  %v100_v53 = vmul.f32 %v83_v43, %v48_v5  ;;  %v99_v54 = vmul.f32 %v83_v43, %v47_v4  ;;  %v609_v40 = vld [vmem:[%s947_s3] ss:$0 sm:$0xff] }
  0xbb   :  { %v97_v47 = vsub.f32 %v95_v45, %v96_v46  ;;  %v104_v55 = vsel %vm59_vm0, %v100_v53, 0.0  ;;  %v101_v56 = vsel %vm59_vm0, %v99_v54, 0.0 }
  0xbd   :  { %v98_v48 = vmax.f32 %v97_v47, 0.0 }
  0xbf   :  { %v108_v49 = vmul.f32 %v98_v48, %v48_v5  ;;  %v107_v50 = vmul.f32 %v98_v48, %v47_v4  ;;  %v679_v4 = vld [vmem:[#allocation2 + $0x4c] ss:$16 sps:$4 sm:$0xff]   ;;  %v681_v5 = vld [vmem:[#allocation2 + $0x40] ss:$16 sps:$4 sm:$0xff]  }
  0xc0   :  { %393 = vmatprep.subr.bf16.mxu1 %v679_v4  ;;  %351 = vmatpush1.bf16.msra.mxu0 %v681_v5 }
  0xc1   :  { %v112_v51 = vsel %vm59_vm0, %v108_v49, 0.0  ;;  %v109_v52 = vsel %vm59_vm0, %v107_v50, 0.0  ;;  %394 = vmatpush1.bf16.msra.mxu1 %v682_v6  ;;  %352 = vmatprep.subr.bf16.mxu0 %v683_v7 }
  0xc2   :  { %113 = vadd.xlane.f32.xlu1 %v112_v51  ;;  %110 = vadd.xlane.f32.xlu0 %v109_v52 }
  0xc3   :  { %395 = vmatprep.subr.bf16.mxu1 %v685_v8 }
  0xc4   :  { %353 = vmatpush1.bf16.msra.mxu0 %v687_v9 }
  0xc5   :  { %396 = vmatpush1.bf16.msra.mxu1 %v688_v10  ;;  %354 = vmatprep.subr.bf16.mxu0 %v689_v11  ;;  %v652_v10 = vld [vmem:[%s949_s5 + $0x2] ss:$0 sm:$0xff] }
  0xc6   :  { %105 = vadd.xlane.f32.xlu1 %v104_v55  ;;  %102 = vadd.xlane.f32.xlu0 %v101_v56  ;;  %v648_v55 = vld [vmem:[%s949_s5] ss:$0 sm:$0xff] }
  0xc7   :  { %397 = vmatprep.subr.bf16.mxu1 %v691_v12 }
  0xc8   :  { %355 = vmatpush1.bf16.msra.mxu0 %v693_v13  ;;  %v653_v13 = vld [vmem:[%s950_s6 + $0x2] ss:$0 sm:$0xff] }
  0xc9   :  { %398 = vmatpush1.bf16.msra.mxu1 %v694_v14  ;;  %356 = vmatprep.subr.bf16.mxu0 %v695_v15 }
  0xca   :  { %399 = vmatprep.subr.bf16.mxu1 %v697_v16  ;;  %v650_v16 = vld [vmem:[%s949_s5 + $0x1] ss:$0 sm:$0xff] }
  0xcc   :  { %357 = vmatpush1.bf16.msra.mxu0 %v699_v17 }
  0xcd   :  { %400 = vmatpush1.bf16.msra.mxu1 %v700_v18  ;;  %358 = vmatprep.subr.bf16.mxu0 %v701_v19  ;;  %v651_v19 = vld [vmem:[%s950_s6 + $0x1] ss:$0 sm:$0xff] }
  0xce   :  { %401 = vmatprep.subr.bf16.mxu1 %v703_v20 }
  0xd0   :  { %359 = vmatpush1.bf16.msra.mxu0 %v705_v21 }
  0xd1   :  { %402 = vmatpush1.bf16.msra.mxu1 %v706_v22  ;;  %360 = vmatprep.subr.bf16.mxu0 %v707_v23  ;;  %v654_v22 = vld [vmem:[%s949_s5 + $0x3] ss:$0 sm:$0xff] }
  0xd2   :  { %403 = vmatprep.subr.bf16.mxu1 %v709_v24 }
  0xd4   :  { %361 = vmatpush1.bf16.msra.mxu0 %v711_v26 }
  0xd5   :  { %404 = vmatpush1.bf16.msra.mxu1 %v712_v27 }
 0x14f   :  { %v114_v28 = vpop.xlane.xlu1 %113  ;;  %v111_v29 = vpop.xlane.xlu0 %110 }
 0x150   :  { %v118_v30 = vadd.f32 1e-05, %v114_v28  ;;  %v117_v31 = vadd.f32 1e-05, %v111_v29 }
 0x152   :  { %715 = vrsqrt.f32 %v118_v30 }
 0x153   :  { %717 = vrsqrt.f32 %v117_v31  ;;  %v106_v32 = vpop.xlane.xlu1 %105  ;;  %v103_v33 = vpop.xlane.xlu0 %102 }
 0x154   :  { %v116_v34 = vsub.f32 %v849_v1, %v106_v32  ;;  %v115_v37 = vsub.f32 %v844_v0, %v103_v33 }
 0x15c   :  { %v716_v35 = vpop.eup %715 }
 0x15d   :  { %v718_v38 = vpop.eup %717  ;;  %v122_v39 = vmul.f32 %v716_v35, %v116_v34 }
 0x15e   :  { %v121_v41 = vmul.f32 %v718_v38, %v115_v37 }
 0x15f   :  { %v131_v42 = vmul.f32 %v608_v36, %v122_v39 }
 0x160   :  { %v130_v43 = vmul.f32 %v608_v36, %v121_v41 }
 0x161   :  { %v140_v44 = vadd.f32 %v609_v40, %v131_v42 }
 0x162   :  { %v139_v45 = vadd.f32 %v609_v40, %v130_v43 }
 0x163   :  { %v144_v46 = vmin.f32 %v140_v44, 0.0  ;;  %vm142_vm1 = vcmp.gt.f32.partialorder %v140_v44, 0.0 }
 0x164   :  { %v143_v1 = vmin.f32 %v139_v45, 0.0  ;;  %vm141_vm2 = vcmp.gt.f32.partialorder %v139_v45, 0.0 }
 0x165   :  { %v147_v47 = vmul.f32 1.442695, %v144_v46 }
 0x166   :  { %v145_v48 = vmul.f32 1.442695, %v143_v1 }
 0x167   :  { %719 = vpow2.f32 %v147_v47 }
 0x168   :  { %721 = vpow2.f32 %v145_v48 }
 0x171   :  { %v720_v49 = vpop.eup %719 }
 0x172   :  { %v722_v50 = vpop.eup %721  ;;  %v611_v0 = vadd.f32 -1.0, %v720_v49 }
 0x173   :  { %v610_v51 = vadd.f32 -1.0, %v722_v50 }
 0x174   :  { %v152_v52 = vsel %vm142_vm1, %v140_v44, %v611_v0 }
 0x175   :  { %v151_v53 = vsel %vm141_vm2, %v139_v45, %v610_v51 }
 0x176   :  { %v153_v54 = vpack.c.bf16 %v152_v52, %v151_v53 }
 0x178   :  { %379 = vmatmul.mubr.bf16.vlgmr.msra.gmra.mrb[0].mxu0 %v153_v54  ;;  %422 = vmatmul.mubr.bf16.vlgmr.msra.gmra.mrb[0].mxu1 %v153_v54 }
 0x24b   :  { %v380_v56 = vpop.f32.mrb[0].mxu0  ;;  %v423_v57 = vpop.f32.mrb[0].mxu1 }
 0x24c   :  { %v382_v58 = vpop.f32.mrb[1].mxu0  ;;  %v425_v59 = vpop.f32.mrb[1].mxu1  ;;  %v467_v60 = vmul.f32 %v648_v55, %v380_v56  ;;  %v480_v9 = vmul.f32 %v649_v3, %v380_v56  ;;  %v519_v12 = vmul.f32 %v652_v10, %v423_v57  ;;  %v532_v15 = vmul.f32 %v653_v13, %v423_v57 }
 0x24d   :  { %v656_v61 = vpack.c.bf16 %v382_v58, %v380_v56  ;;  %v657_v62 = vpack.c.bf16 %v425_v59, %v423_v57  ;;  %v384_v63 = vpop.f32.mrb[2].mxu0  ;;  %v427_v2 = vpop.f32.mrb[2].mxu1  ;;  %v493_v18 = vmul.f32 %v650_v16, %v382_v58  ;;  %v506_v21 = vmul.f32 %v651_v19, %v382_v58 }
 0x24e   :  { %v429_v4 = vpop.f32.mrb[3].mxu1  ;;  %469 = vadd.xlane.f32.xlu0 %v467_v60  ;;  %v386_v5 = vpop.f32.mrb[3].mxu0  ;;  %v468_v6 = vmul.f32 %v648_v55, %v384_v63  ;;  %v481_v11 = vmul.f32 %v649_v3, %v384_v63  ;;  %v520_v14 = vmul.f32 %v652_v10, %v427_v2  ;;  %v533_v17 = vmul.f32 %v653_v13, %v427_v2 }
 0x24f   :  { %456 = vst [vmem:[#allocation5] sm:$0xff] %v656_v61  ;;  %457 = vst [vmem:[#allocation5 + $0x8] sm:$0xff] %v657_v62  ;;  %v659_v7 = vpack.c.bf16 %v429_v4, %v427_v2  ;;  %v658_v8 = vpack.c.bf16 %v386_v5, %v384_v63  ;;  %v494_v20 = vmul.f32 %v650_v16, %v386_v5 }
 0x250   :  { %471 = vadd.xlane.f32.xlu1 %v468_v6  ;;  %v507_v23 = vmul.f32 %v651_v19, %v386_v5  ;;  %v545_v24 = vmul.f32 %v654_v22, %v425_v59  ;;  %v546_v26 = vmul.f32 %v654_v22, %v429_v4  ;;  %v558_v27 = vmul.f32 %v655_v25, %v425_v59 }
 0x251   :  { %459 = vst [vmem:[#allocation5 + $0x18] sm:$0xff] %v659_v7  ;;  %458 = vst [vmem:[#allocation5 + $0x10] sm:$0xff] %v658_v8  ;;  %v559_v28 = vmul.f32 %v655_v25, %v429_v4 }
 0x252   :  { %482 = vadd.xlane.f32.xlu0 %v480_v9 }
 0x254   :  { %484 = vadd.xlane.f32.xlu1 %v481_v11 }
 0x256   :  { %521 = vadd.xlane.f32.xlu0 %v519_v12 }
 0x258   :  { %523 = vadd.xlane.f32.xlu1 %v520_v14 }
 0x25a   :  { %534 = vadd.xlane.f32.xlu0 %v532_v15 }
 0x25c   :  { %536 = vadd.xlane.f32.xlu1 %v533_v17 }
 0x25e   :  { %495 = vadd.xlane.f32.xlu0 %v493_v18 }
 0x260   :  { %497 = vadd.xlane.f32.xlu1 %v494_v20 }
 0x262   :  { %508 = vadd.xlane.f32.xlu0 %v506_v21 }
 0x264   :  { %510 = vadd.xlane.f32.xlu1 %v507_v23 }
 0x266   :  { %547 = vadd.xlane.f32.xlu0 %v545_v24 }
 0x268   :  { %549 = vadd.xlane.f32.xlu1 %v546_v26 }
 0x26a   :  { %560 = vadd.xlane.f32.xlu0 %v558_v27 }
 0x26c   :  { %562 = vadd.xlane.f32.xlu1 %v559_v28 }
 0x26d   :  { %756 = shalt.err (!%p753_p12)
}
 0x26e   :  { %s757_s6 = scalar_lea.hbm %s951_s7, 512 }
 0x26f   :  { %p758_p13 = scmp.ne.s32.totalorder %s951_s7, %s757_s6  ;;  %p761_p0 = scmp.lt.u32.totalorder %s757_s6, %s951_s7 }
 0x271   :  { %p763_p1 = pnand %p761_p0, %p758_p13 }
 0x273   :  { %766 = shalt.err (!%p763_p1)
}
 0x274   :  { %594 = dma.vmem_to_hbm [thread:$0]  %s589_s27, 512, %s951_s7, [#allocation4], %s772_s19, %s772_s19, %s773_s20   ;;  %vm564_vm3 = vcmask 7168   ;;  %vm569_vm4 = vcmask 23552   ;;  %vm572_vm5 = vcmask 31744  }
 0x2db   :  { %v470_v29 = vpop.xlane.xlu0 %469 }
 0x2dd   :  { %v472_v30 = vpop.xlane.xlu1 %471 }
 0x2df   :  { %v483_v31 = vpop.xlane.xlu0 %482 }
 0x2e1   :  { %v485_v32 = vpop.xlane.xlu1 %484 }
 0x2e3   :  { %v522_v33 = vpop.xlane.xlu0 %521 }
 0x2e5   :  { %v524_v34 = vpop.xlane.xlu1 %523 }
 0x2e7   :  { %v535_v35 = vpop.xlane.xlu0 %534 }
 0x2e9   :  { %v537_v36 = vpop.xlane.xlu1 %536 }
 0x2eb   :  { %v496_v37 = vpop.xlane.xlu0 %495 }
 0x2ec   :  { %v575_v40 = vsel %vm564_vm3, %v470_v29, %v496_v37 }
 0x2ed   :  { %v498_v38 = vpop.xlane.xlu1 %497  ;;  %v577_v43 = vsel %vm59_vm0, %v575_v40, %v522_v33 }
 0x2ee   :  { %v576_v42 = vsel %vm564_vm3, %v472_v30, %v498_v38 }
 0x2ef   :  { %v509_v39 = vpop.xlane.xlu0 %508  ;;  %v578_v1 = vsel %vm59_vm0, %v576_v42, %v524_v34 }
 0x2f0   :  { %v565_v45 = vsel %vm564_vm3, %v483_v31, %v509_v39 }
 0x2f1   :  { %v511_v41 = vpop.xlane.xlu1 %510  ;;  %v567_v50 = vsel %vm59_vm0, %v565_v45, %v535_v35 }
 0x2f2   :  { %v566_v48 = vsel %vm564_vm3, %v485_v32, %v511_v41 }
 0x2f3   :  { %v548_v44 = vpop.xlane.xlu0 %547  ;;  %v568_v52 = vsel %vm59_vm0, %v566_v48, %v537_v36 }
 0x2f4   :  { %v579_v46 = vsel %vm569_vm4, %v577_v43, %v548_v44 }
 0x2f5   :  { %581 = vst.msk [vmem:[%s953_s9] sm:$0xff] %vm572_vm5, %v579_v46  ;;  %v550_v47 = vpop.xlane.xlu1 %549 }
 0x2f6   :  { %v580_v49 = vsel %vm569_vm4, %v578_v1, %v550_v47 }
 0x2f7   :  { %582 = vst.msk [vmem:[%s953_s9 + $0x8] sm:$0xff] %vm572_vm5, %v580_v49  ;;  %v561_v0 = vpop.xlane.xlu0 %560 }
 0x2f8   :  { %v570_v51 = vsel %vm569_vm4, %v567_v50, %v561_v0 }
 0x2f9   :  { %573 = vst.msk [vmem:[%s952_s8] sm:$0xff] %vm572_vm5, %v570_v51  ;;  %v563_v53 = vpop.xlane.xlu1 %562 }
 0x2fa   :  { %v571_v54 = vsel %vm569_vm4, %v568_v52, %v563_v53 }
 0x2fb   :  { %574 = vst.msk [vmem:[%s952_s8 + $0x8] sm:$0xff] %vm572_vm5, %v571_v54 }
 0x2fc   :  { %769 = dma.done.wait [#allocation4], 512  }
 0x2fd   :  { %770 = vsyncadd [#allocation4], 4294966784 }
 0x2fe   :  { %606 = vsyncpa [#allocation3], 1 }
 0x2ff   :  { %607 = vsyncpa [#allocation4], 1 }

</bundles_post_ra>
